<compile_context>
chip_gen: v7x
topology: tpu7x:2x2x1
jax: 0.10.0
libtpu: 0.0.40
codegen_flags: <defaults>
</compile_context>

<pallas_src>
import jax
import jax.numpy as jnp
from jax.experimental import pallas as pl
from jax.experimental.pallas import tpu as pltpu


def _round_up(n, m):
    return ((n + m - 1) // m) * m


def _make_mlp_kernel(num_hidden):
    """Builds the fused kernel for `num_hidden` hidden layers.

    Ref layout:
      x_ref            : (TB, D) float32 tile of the (B, D) input
      per hidden layer : w_ref (H_l, H_{l-1}) with BN scale folded in (compute
                         dtype), t_ref (H_l, 1) fused shift (bias + BN), f32
      w_out_ref        : (O, H_last) compute dtype, b_out_ref (O, 1) f32
      o_ref            : (O, TB) f32   (batch on lanes -> lane-dense store)
    """

    def kernel(*refs):
        x_ref = refs[0]
        w_out_ref = refs[1 + 2 * num_hidden]
        b_out_ref = refs[2 + 2 * num_hidden]
        o_ref = refs[-1]

        cdt = w_out_ref.dtype  # compute dtype (f32 or bf16)

        # x tile arrives (TB, D) f32; cast on the VPU, hidden under the DMA.
        h = x_ref[...].astype(cdt)
        feat_last = True  # h currently has the feature (contraction) dim last

        for li in range(num_hidden):
            w_ref = refs[1 + 2 * li]
            t_ref = refs[2 + 2 * li]
            # Linear + BatchNorm(eval) + ReLU   (Dropout(eval) == identity).
            # First layer contracts dim 1 of both operands (in-MXU "transpose"
            # of the batch-major x tile); later layers are canonical matmuls.
            dn = (((1,), (1,) if feat_last else (0,)), ((), ()))
            acc = jax.lax.dot_general(w_ref[...], h, dn,
                                      preferred_element_type=jnp.float32)
            h = jnp.maximum(acc + t_ref[...], 0.0).astype(cdt)  # (H_l, TB)
            feat_last = False

        dn = (((1,), (1,) if feat_last else (0,)), ((), ()))
        out = jax.lax.dot_general(w_out_ref[...], h, dn,
                                  preferred_element_type=jnp.float32)
        out = out + b_out_ref[...]                               # (O, TB) f32

        # Per-output final activations [exp, sigmoid, softplus, identity]
        # via a row select over the full tile: transcendentals ride the idle
        # EUP slot, no sublane slicing / relayout, single lane-dense store.
        row = jax.lax.broadcasted_iota(jnp.int32, out.shape, 0)
        o_ref[...] = jnp.where(
            row == 0, jnp.exp(out),
            jnp.where(row == 1, jax.nn.sigmoid(out),
                      jnp.where(row == 2, jax.nn.softplus(out),
                                out))).astype(o_ref.dtype)

    return kernel


def photon_arrival_time_pars(x, folded, *, tile_b=4096):
    """Fused MLP forward pass.

    x      : (B, D) float32  (left untouched in HBM; cast/transpose in-kernel)
    folded : dict from fold_params() (pre-transposed / BN-folded weights).
    Returns (B, O) float32.
    """
    B, D = x.shape
    ws, ts = folded["w"], folded["t"]
    w_out, b_out = folded["w_out"], folded["b_out"]
    num_hidden = len(ws)
    O = w_out.shape[0]
    assert O == 4, "final activations hard-wired to [exp, sigmoid, softplus, id]"

    # Batch tile: multiple of 128 lanes, large (amortises ~0.35us/step),
    # balanced across tiles, and capped so the grid stays >= 2 when the batch
    # is big enough (so the 'parallel' axis uses both v7x TensorCores).
    Bp = _round_up(B, 128)
    tb_req = max(128, min(_round_up(tile_b, 128), Bp))
    num_tiles = pl.cdiv(Bp, tb_req)
    if num_tiles < 2 and Bp >= 256:
        num_tiles = 2
    tb = _round_up(pl.cdiv(Bp, num_tiles), 128)
    grid = (pl.cdiv(B, tb),)   # partial last block handled by masked DMA/stores

    def const_spec(arr):
        nd = arr.ndim
        return pl.BlockSpec(arr.shape, lambda i, _nd=nd: (0,) * _nd)

    in_specs = [pl.BlockSpec((tb, D), lambda i: (i, 0))]   # x tile, no pre-pass
    operands = [x]
    for w, t in zip(ws, ts):
        in_specs += [const_spec(w), const_spec(t)]
        operands += [w, t]
    in_specs += [const_spec(w_out), const_spec(b_out)]
    operands += [w_out, b_out]

    out_T = pl.pallas_call(
        _make_mlp_kernel(num_hidden),
        out_shape=jax.ShapeDtypeStruct((O, B), jnp.float32),
        grid=grid,
        in_specs=in_specs,
        out_specs=pl.BlockSpec((O, tb), lambda i: (0, i)),
        compiler_params=pltpu.CompilerParams(
            dimension_semantics=("parallel",)),
    )(*operands)

    # Layout plumbing only: tiny (B, 4) transpose back to module output layout.
    return out_T.T


# ----------------------------------------------------------------------------
# Parameter construction / folding / reference
# ----------------------------------------------------------------------------
def make_raw_params(key, input_size, n_per_layer, output_size):
    """Deterministic synthetic module parameters (torch-equivalent eval state)."""
    dims = [input_size] + list(n_per_layer)
    hidden = []
    for li in range(len(n_per_layer)):
        key, *ks = jax.random.split(key, 7)
        din, dout = dims[li], dims[li + 1]
        hidden.append(dict(
            w=jax.random.normal(ks[0], (din, dout), jnp.float32) * 0.1,
            b=jax.random.normal(ks[1], (dout,), jnp.float32) * 0.1,
            gamma=1.0 + 0.1 * jax.random.normal(ks[2], (dout,), jnp.float32),
            beta=0.1 * jax.random.normal(ks[3], (dout,), jnp.float32),
            mean=0.1 * jax.random.normal(ks[4], (dout,), jnp.float32),
            var=jnp.abs(1.0 + 0.1 * jax.random.normal(ks[5], (dout,), jnp.float32)),
        ))
    key, kw, kb = jax.random.split(key, 3)
    return dict(
        hidden=hidden,
        w_out=jax.random.normal(kw, (dims[-1], output_size), jnp.float32) * 0.1,
        b_out=jax.random.normal(kb, (output_size,), jnp.float32) * 0.1,
    )


def fold_params(raw, compute_dtype=jnp.float32, eps=1e-5):
    """Fold eval-mode BatchNorm (+ Linear bias) into transposed weights/shifts."""
    ws, ts = [], []
    for layer in raw["hidden"]:
        scale = layer["gamma"] / jnp.sqrt(layer["var"] + eps)            # (H,)
        shift = (layer["b"] - layer["mean"]) * scale + layer["beta"]     # (H,)
        w_folded = layer["w"] * scale[None, :]                           # (Din, H)
        ws.append(w_folded.T.astype(compute_dtype))                      # (H, Din)
        ts.append(shift.reshape(-1, 1).astype(jnp.float32))              # (H, 1)
    return {
        "w": ws,
        "t": ts,
        "w_out": raw["w_out"].T.astype(compute_dtype),                   # (O, Hlast)
        "b_out": raw["b_out"].reshape(-1, 1).astype(jnp.float32),        # (O, 1)
    }


def reference_forward(x, raw, eps=1e-5):
    """Pure-JAX f32 reference (eval-mode module semantics)."""
    h = x
    for layer in raw["hidden"]:
        h = h @ layer["w"] + layer["b"]
        h = (h - layer["mean"]) / jnp.sqrt(layer["var"] + eps) \
            * layer["gamma"] + layer["beta"]
        h = jnp.maximum(h, 0.0)
    out = h @ raw["w_out"] + raw["b_out"]
    return jnp.concatenate(
        [jnp.exp(out[:, 0:1]), jax.nn.sigmoid(out[:, 1:2]),
         jax.nn.softplus(out[:, 2:3]), out[:, 3:4]], axis=-1)


if __name__ == "__main__":
    # Small, module-consistent shapes: input_size=16, n_per_layer=[32, 32],
    # output_size=4 (exp / sigmoid / softplus / identity heads).
    D = 16
    n_per_layer = [32, 32]
    O = 4

    key = jax.random.PRNGKey(0)
    kx, kx2, kp = jax.random.split(key, 3)
    raw = make_raw_params(kp, D, n_per_layer, O)

    # --- batch=64, single tile, f32 and bf16 operand paths -------------------
    B = 64
    x = jax.random.normal(kx, (B, D), jnp.float32)
    ref = reference_forward(x, raw)

    p_f32 = fold_params(raw, jnp.float32)
    out_f32 = jax.block_until_ready(photon_arrival_time_pars(x, p_f32))
    assert out_f32.shape == (B, O)
    assert jnp.allclose(out_f32, ref, atol=1e-4, rtol=1e-4), "f32 mismatch vs reference"

    # bf16 weights, x kept f32 in HBM and cast in-kernel; f32 accumulation.
    p_bf16 = fold_params(raw, jnp.bfloat16)
    out_bf16 = jax.block_until_ready(photon_arrival_time_pars(x, p_bf16))
    assert out_bf16.shape == (B, O)
    assert jnp.allclose(out_bf16, ref, atol=5e-2, rtol=5e-2), "bf16 mismatch vs reference"

    # --- batch=200 with a small tile: exercises grid>1 + partial last block ---
    B2 = 200
    x2 = jax.random.normal(kx2, (B2, D), jnp.float32)
    ref2 = reference_forward(x2, raw)
    out2 = jax.block_until_ready(photon_arrival_time_pars(x2, p_f32, tile_b=128))
    assert out2.shape == (B2, O)
    assert jnp.allclose(out2, ref2, atol=1e-4, rtol=1e-4), "partial-tile mismatch"

    print("KERNEL_OK")
</pallas_src>

<mosaic_0001>
module attributes {stable_mosaic.version = 11 : i64} {
  func.func @kernel(%arg0: i32, %arg1: memref<128x16xf32, #tpu.memory_space<vmem>>, %arg2: memref<32x16xf32, #tpu.memory_space<vmem>>, %arg3: memref<32x1xf32, #tpu.memory_space<vmem>>, %arg4: memref<32x32xf32, #tpu.memory_space<vmem>>, %arg5: memref<32x1xf32, #tpu.memory_space<vmem>>, %arg6: memref<4x32xf32, #tpu.memory_space<vmem>>, %arg7: memref<4x1xf32, #tpu.memory_space<vmem>>, %arg8: memref<4x128xf32, #tpu.memory_space<vmem>>) attributes {dimension_semantics = [#tpu.dimension_semantics<parallel>], iteration_bounds = array<i64: 1>, scalar_prefetch = 0 : i64, scratch_operands = 0 : i64, tpu.core_type = #tpu.core_type<tc>, window_params = [{transform_indices = @transform_0, window_bounds = array<i64: 128, 16>}, {pipeline_mode = #tpu.pipeline_mode<synchronous>, transform_indices = @transform_1, window_bounds = array<i64: 32, 16>}, {pipeline_mode = #tpu.pipeline_mode<synchronous>, transform_indices = @transform_2, window_bounds = array<i64: 32, 1>}, {pipeline_mode = #tpu.pipeline_mode<synchronous>, transform_indices = @transform_3, window_bounds = array<i64: 32, 32>}, {pipeline_mode = #tpu.pipeline_mode<synchronous>, transform_indices = @transform_4, window_bounds = array<i64: 32, 1>}, {pipeline_mode = #tpu.pipeline_mode<synchronous>, transform_indices = @transform_5, window_bounds = array<i64: 4, 32>}, {pipeline_mode = #tpu.pipeline_mode<synchronous>, transform_indices = @transform_6, window_bounds = array<i64: 4, 1>}, {transform_indices = @transform_7, window_bounds = array<i64: 4, 128>}]} {
    %c0 = arith.constant 0 : index
    %c0_0 = arith.constant 0 : index
    %0 = vector.load %arg1[%c0, %c0_0] : memref<128x16xf32, #tpu.memory_space<vmem>>, vector<128x16xf32>
    %c0_1 = arith.constant 0 : index
    %c0_2 = arith.constant 0 : index
    %1 = vector.load %arg2[%c0_1, %c0_2] : memref<32x16xf32, #tpu.memory_space<vmem>>, vector<32x16xf32>
    %cst = arith.constant dense<0.000000e+00> : vector<32x128xf32>
    %2 = tpu.matmul %1, %0, %cst {dimension_numbers = #tpu.dot_dimension_numbers<[1], [1], [0], [0], [0, 0, 1, 0], [], []>} : vector<32x16xf32>, vector<128x16xf32>, vector<32x128xf32> -> vector<32x128xf32>
    %c0_3 = arith.constant 0 : index
    %c0_4 = arith.constant 0 : index
    %3 = vector.load %arg3[%c0_3, %c0_4] : memref<32x1xf32, #tpu.memory_space<vmem>>, vector<32x1xf32>
    %4 = vector.broadcast %3 : vector<32x1xf32> to vector<32x128xf32>
    %5 = arith.addf %2, %4 : vector<32x128xf32>
    %cst_5 = arith.constant 0.000000e+00 : f32
    %6 = vector.broadcast %cst_5 : f32 to vector<32x128xf32>
    %7 = arith.maximumf %5, %6 : vector<32x128xf32>
    %c0_6 = arith.constant 0 : index
    %c0_7 = arith.constant 0 : index
    %8 = vector.load %arg4[%c0_6, %c0_7] : memref<32x32xf32, #tpu.memory_space<vmem>>, vector<32x32xf32>
    %cst_8 = arith.constant dense<0.000000e+00> : vector<32x128xf32>
    %9 = tpu.matmul %8, %7, %cst_8 {dimension_numbers = #tpu.dot_dimension_numbers<[1], [0], [0], [1], [0, 0, 1, 1], [], []>} : vector<32x32xf32>, vector<32x128xf32>, vector<32x128xf32> -> vector<32x128xf32>
    %c0_9 = arith.constant 0 : index
    %c0_10 = arith.constant 0 : index
    %10 = vector.load %arg5[%c0_9, %c0_10] : memref<32x1xf32, #tpu.memory_space<vmem>>, vector<32x1xf32>
    %11 = vector.broadcast %10 : vector<32x1xf32> to vector<32x128xf32>
    %12 = arith.addf %9, %11 : vector<32x128xf32>
    %cst_11 = arith.constant 0.000000e+00 : f32
    %13 = vector.broadcast %cst_11 : f32 to vector<32x128xf32>
    %14 = arith.maximumf %12, %13 : vector<32x128xf32>
    %c0_12 = arith.constant 0 : index
    %c0_13 = arith.constant 0 : index
    %15 = vector.load %arg6[%c0_12, %c0_13] : memref<4x32xf32, #tpu.memory_space<vmem>>, vector<4x32xf32>
    %cst_14 = arith.constant dense<0.000000e+00> : vector<4x128xf32>
    %16 = tpu.matmul %15, %14, %cst_14 {dimension_numbers = #tpu.dot_dimension_numbers<[1], [0], [0], [1], [0, 0, 1, 1], [], []>} : vector<4x32xf32>, vector<32x128xf32>, vector<4x128xf32> -> vector<4x128xf32>
    %c0_15 = arith.constant 0 : index
    %c0_16 = arith.constant 0 : index
    %17 = vector.load %arg7[%c0_15, %c0_16] : memref<4x1xf32, #tpu.memory_space<vmem>>, vector<4x1xf32>
    %18 = vector.broadcast %17 : vector<4x1xf32> to vector<4x128xf32>
    %19 = arith.addf %16, %18 : vector<4x128xf32>
    %20 = tpu.iota {dimensions = array<i32: 0>} : vector<4x128xi32>
    %c0_i32 = arith.constant 0 : i32
    %21 = vector.broadcast %c0_i32 : i32 to vector<4x128xi32>
    %22 = arith.cmpi eq, %20, %21 : vector<4x128xi32>
    %23 = math.exp %19 : vector<4x128xf32>
    %c1_i32 = arith.constant 1 : i32
    %24 = vector.broadcast %c1_i32 : i32 to vector<4x128xi32>
    %25 = arith.cmpi eq, %20, %24 : vector<4x128xi32>
    %26 = arith.negf %19 : vector<4x128xf32>
    %27 = math.exp %26 : vector<4x128xf32>
    %cst_17 = arith.constant 1.000000e+00 : f32
    %28 = vector.broadcast %cst_17 : f32 to vector<4x128xf32>
    %29 = arith.addf %28, %27 : vector<4x128xf32>
    %30 = arith.divf %28, %29 : vector<4x128xf32>
    %c2_i32 = arith.constant 2 : i32
    %31 = vector.broadcast %c2_i32 : i32 to vector<4x128xi32>
    %32 = arith.cmpi eq, %20, %31 : vector<4x128xi32>
    %cst_18 = arith.constant 0.000000e+00 : f32
    %33 = vector.broadcast %cst_18 : f32 to vector<4x128xf32>
    %34 = arith.maximumf %19, %33 : vector<4x128xf32>
    %35 = vector.broadcast %cst_18 : f32 to vector<4x128xf32>
    %36 = arith.subf %19, %35 : vector<4x128xf32>
    %37 = arith.cmpf one, %36, %36 : vector<4x128xf32>
    %38 = vector.broadcast %cst_18 : f32 to vector<4x128xf32>
    %39 = arith.addf %19, %38 : vector<4x128xf32>
    %40 = math.absf %36 : vector<4x128xf32>
    %cst_19 = arith.constant 0.000000e+00 : f32
    %41 = vector.broadcast %cst_19 : f32 to vector<4x128xf32>
    %42 = arith.subf %41, %40 : vector<4x128xf32>
    %43 = math.exp %42 : vector<4x128xf32>
    %44 = math.log1p %43 : vector<4x128xf32>
    %45 = arith.addf %34, %44 : vector<4x128xf32>
    %46 = arith.select %37, %39, %45 : vector<4x128xi1>, vector<4x128xf32>
    %47 = arith.select %32, %46, %19 : vector<4x128xi1>, vector<4x128xf32>
    %48 = arith.select %25, %30, %47 : vector<4x128xi1>, vector<4x128xf32>
    %49 = arith.select %22, %23, %48 : vector<4x128xi1>, vector<4x128xf32>
    %c0_20 = arith.constant 0 : index
    %c0_21 = arith.constant 0 : index
    %50 = vector.load %arg8[%c0_20, %c0_21] : memref<4x128xf32, #tpu.memory_space<vmem>>, vector<4x128xf32>
    tpu.vector_store %arg8[%c0_20, %c0_21], %49 {strides = array<i32>} : memref<4x128xf32, #tpu.memory_space<vmem>>, vector<4x128xf32>,
    return
  }
  func.func @transform_0(%arg0: i32) -> (i32, i32) {
    %c0_i32 = arith.constant 0 : i32
    %c0_i32_0 = arith.constant 0 : i32
    return %arg0, %c0_i32 : i32, i32
  }
  func.func @transform_1(%arg0: i32) -> (i32, i32) {
    %c0_i32 = arith.constant 0 : i32
    %c0_i32_0 = arith.constant 0 : i32
    %c0_i32_1 = arith.constant 0 : i32
    return %c0_i32, %c0_i32_0 : i32, i32
  }
  func.func @transform_2(%arg0: i32) -> (i32, i32) {
    %c0_i32 = arith.constant 0 : i32
    %c0_i32_0 = arith.constant 0 : i32
    %c0_i32_1 = arith.constant 0 : i32
    return %c0_i32, %c0_i32_0 : i32, i32
  }
  func.func @transform_3(%arg0: i32) -> (i32, i32) {
    %c0_i32 = arith.constant 0 : i32
    %c0_i32_0 = arith.constant 0 : i32
    %c0_i32_1 = arith.constant 0 : i32
    return %c0_i32, %c0_i32_0 : i32, i32
  }
  func.func @transform_4(%arg0: i32) -> (i32, i32) {
    %c0_i32 = arith.constant 0 : i32
    %c0_i32_0 = arith.constant 0 : i32
    %c0_i32_1 = arith.constant 0 : i32
    return %c0_i32, %c0_i32_0 : i32, i32
  }
  func.func @transform_5(%arg0: i32) -> (i32, i32) {
    %c0_i32 = arith.constant 0 : i32
    %c0_i32_0 = arith.constant 0 : i32
    %c0_i32_1 = arith.constant 0 : i32
    return %c0_i32, %c0_i32_0 : i32, i32
  }
  func.func @transform_6(%arg0: i32) -> (i32, i32) {
    %c0_i32 = arith.constant 0 : i32
    %c0_i32_0 = arith.constant 0 : i32
    %c0_i32_1 = arith.constant 0 : i32
    return %c0_i32, %c0_i32_0 : i32, i32
  }
  func.func @transform_7(%arg0: i32) -> (i32, i32) {
    %c0_i32 = arith.constant 0 : i32
    %c0_i32_0 = arith.constant 0 : i32
    return %c0_i32, %arg0 : i32, i32
  }
}

</mosaic_0001>

<bundles_post_ra>
// kernel: tpu_custom_call.1
= control target key start
LH: loop header
LB: loop body
LE: loop exit
PB: predicated region body
PF: predicated region fallthrough
CT: control target
= control target key end

     0   :  { %vm71_vm0 = vcmask 130048   ;;  %v705_v6 = vmov 0   ;;  %s911_s0 = inlined_call_operand.vmem [shape: f32[64,16], index: 0, kind: input, shape index: {}]   ;;  %s912_s1 = inlined_call_operand.vmem [shape: f32[32,16], index: 1, kind: input, shape index: {}]   ;;  %s913_s2 = inlined_call_operand.vmem [shape: f32[32,1], index: 2, kind: input, shape index: {}]   ;;  %s914_s3 = inlined_call_operand.vmem [shape: f32[32,32], index: 3, kind: input, shape index: {}]   ;;  %s915_s4 = inlined_call_operand.vmem [shape: f32[32,1], index: 4, kind: input, shape index: {}]   ;;  %s916_s5 = inlined_call_operand.vmem [shape: f32[4,32], index: 5, kind: input, shape index: {}]   ;;  %s917_s6 = inlined_call_operand.vmem [shape: f32[4,1], index: 6, kind: input, shape index: {}]   ;;  %s918_s7 = inlined_call_operand.hbm [shape: f32[4,64], index: 7, kind: output, shape index: {}]  }
   0x1   :  { %v27_v0 = vld [vmem:[%s911_s0] sm:$0xff]  ;;  %v28_v1 = vld [vmem:[%s911_s0 + $0x8] sm:$0xff]  ;;  %v29_v2 = vld [vmem:[%s911_s0 + $0x10] sm:$0xff]  ;;  %669 = vset.pattern.permute.xlu0 %v705_v6  ;;  %670 = vset.pattern.permute.xlu1 %v705_v6 }
   0x2   :  { %v602_v3 = vpack.c.bf16 %v28_v1, %v27_v0  ;;  %vm761_vm1 = vmpackc.low %vm71_vm0, %vm71_vm0  ;;  %v30_v5 = vld [vmem:[%s911_s0 + $0x18] sm:$0xff]  ;;  %v43_v8 = vld [vmem:[%s912_s1] sm:$0xff] }
   0x3   :  { %v608_v7 = vpack.c.bf16 %v30_v5, %v29_v2  ;;  %v31_v9 = vld [vmem:[%s911_s0 + $0x20] sm:$0xff]  ;;  %v32_v10 = vld [vmem:[%s911_s0 + $0x28] sm:$0xff]  ;;  %571 = vmatprep.mubr.msk.f32.mxu0 %vm71_vm0, %v43_v8  ;;  %v49_v12 = vld [vmem:[%s913_s2 + $0x10] sm:$0xff] }
   0x4   :  { %604 = vmatprep.subr.msk.bf16.mxu0 %vm761_vm1, %v602_v3  ;;  %v47_v11 = vld [vmem:[%s913_s2] sm:$0xff]  ;;  %63 = vperm.xlu1 %670, %v49_v12   ;;  %v614_v13 = vpack.c.bf16 %v32_v10, %v31_v9  ;;  %v48_v14 = vld [vmem:[%s913_s2 + $0x8] sm:$0xff]  ;;  %v50_v15 = vld [vmem:[%s913_s2 + $0x18] sm:$0xff] }
   0x5   :  { %607 = vmatpush3.bf16.xpose.msk.msra.mxu0 %vm761_vm1, %v602_v3  ;;  %53 = vperm.xlu0 %669, %v47_v11  }
   0x6   :  { %610 = vmatprep.subr.msk.bf16.mxu0 %vm761_vm1, %v608_v7 }
   0x7   :  { %12 = vsyncpa [#allocation3], 0  ;;  %v225_v16 = vld [vmem:[%s915_s4] sm:$0xff]  ;;  %v33_v17 = vld [vmem:[%s911_s0 + $0x30] sm:$0xff]  ;;  %vm249_vm2 = vcmask 261120   ;;  %v706_v61 = vmov 0.0|0.0  }
   0x8   :  { %68 = vperm.xlu1 %670, %v50_v15   ;;  %v34_v18 = vld [vmem:[%s911_s0 + $0x38] sm:$0xff]  ;;  %v226_v19 = vld [vmem:[%s915_s4 + $0x8] sm:$0xff]  ;;  %v227_v21 = vld [vmem:[%s915_s4 + $0x10] sm:$0xff]  ;;  %vm707_vm3 = vmmov 0   ;;  %v708_v62 = vmov 0.0  }
   0x9   :  { %58 = vperm.xlu0 %669, %v48_v14   ;;  %v620_v20 = vpack.c.bf16 %v34_v18, %v33_v17  ;;  %v228_v22 = vld [vmem:[%s915_s4 + $0x18] sm:$0xff]  ;;  %v352_v23 = vld [vmem:[%s917_s6] sm:$0xf]  ;;  %v36_v25 = vld [vmem:[%s911_s0 + $0x48] sm:$0xff] }
   0xa   :  { %v35_v24 = vld [vmem:[%s911_s0 + $0x40] sm:$0xff]  ;;  %v37_v27 = vld [vmem:[%s911_s0 + $0x50] sm:$0xff]  ;;  %v38_v28 = vld [vmem:[%s911_s0 + $0x58] sm:$0xff] }
   0xb   :  { %v626_v26 = vpack.c.bf16 %v36_v25, %v35_v24  ;;  %v632_v29 = vpack.c.bf16 %v38_v28, %v37_v27  ;;  %v39_v30 = vld [vmem:[%s911_s0 + $0x60] sm:$0xff]  ;;  %v40_v31 = vld [vmem:[%s911_s0 + $0x68] sm:$0xff]  ;;  %v41_v33 = vld [vmem:[%s911_s0 + $0x70] sm:$0xff] }
   0xc   :  { %236 = vperm.xlu1 %670, %v226_v19   ;;  %v638_v32 = vpack.c.bf16 %v40_v31, %v39_v30  ;;  %v42_v34 = vld [vmem:[%s911_s0 + $0x78] sm:$0xff]  ;;  %v44_v36 = vld [vmem:[%s912_s1 + $0x8] sm:$0xff]  ;;  %v45_v37 = vld [vmem:[%s912_s1 + $0x10] sm:$0xff] }
   0xd   :  { %613 = vmatpush3.bf16.xpose.msk.msra.mxu0 %vm761_vm1, %v608_v7  ;;  %231 = vperm.xlu0 %669, %v225_v16   ;;  %v644_v35 = vpack.c.bf16 %v42_v34, %v41_v33  ;;  %v46_v38 = vld [vmem:[%s912_s1 + $0x18] sm:$0xff]  ;;  %v221_v39 = vld [vmem:[%s914_s3] sm:$0xff]  ;;  %v222_v58 = vld [vmem:[%s914_s3 + $0x8] sm:$0xff] }
   0xe   :  { %616 = vmatprep.subr.msk.bf16.mxu0 %vm761_vm1, %v614_v13  ;;  %585 = vmatprep.mubr.msk.f32.mxu1 %vm249_vm2, %v221_v39  ;;  %v223_v59 = vld [vmem:[%s914_s3 + $0x10] sm:$0xff]  ;;  %v224_v60 = vld [vmem:[%s914_s3 + $0x18] sm:$0xff]  ;;  %v351_v17 = vld [vmem:[%s916_s5] sm:$0xf]  ;;  %s709_s5 = smov [#allocation2]  }
   0xf   :  { %s472_s16 = sshll.u32 %s709_s5, 4  ;;  %s473_s16 = int_to_ptr.vmem [resolvable:$true] %s472_s16 }
  0x10   :  { %246 = vperm.xlu1 %670, %v228_v22   ;;  %s681_s4 = scalar_lea.vmem %s473_s16, 64  ;;  %p686_p1 = scmp.lt.s32.totalorder %s473_s16, %s473_s16 }
  0x11   :  { %241 = vperm.xlu0 %669, %v227_v21   ;;  %p682_p0 = scmp.ne.s32.totalorder %s473_s16, %s681_s4  ;;  %p687_p2 = scmp.lt.s32.totalorder %s681_s4, %s681_s4 }
  0x13   :  { %p688_p3 = por %p687_p2, %p686_p1 }
  0x15   :  { %619 = vmatpush3.bf16.xpose.msk.msra.mxu0 %vm761_vm1, %v614_v13  ;;  %355 = vperm.xlu0 %669, %v352_v23   ;;  %p689_p4 = pnand %p688_p3, %p682_p0 }
  0x16   :  { %622 = vmatprep.subr.msk.bf16.mxu0 %vm761_vm1, %v620_v20 }
  0x1d   :  { %625 = vmatpush3.bf16.xpose.msk.msra.mxu0 %vm761_vm1, %v620_v20 }
  0x1e   :  { %628 = vmatprep.subr.msk.bf16.mxu0 %vm761_vm1, %v626_v26 }
  0x25   :  { %631 = vmatpush3.bf16.xpose.msk.msra.mxu0 %vm761_vm1, %v626_v26 }
  0x26   :  { %634 = vmatprep.subr.msk.bf16.mxu0 %vm761_vm1, %v632_v29 }
  0x2d   :  { %637 = vmatpush3.bf16.xpose.msk.msra.mxu0 %vm761_vm1, %v632_v29 }
  0x2e   :  { %640 = vmatprep.subr.msk.bf16.mxu0 %vm761_vm1, %v638_v32 }
  0x35   :  { %643 = vmatpush3.bf16.xpose.msk.msra.mxu0 %vm761_vm1, %v638_v32  ;;  %v431_v32 = vlaneseq }
  0x36   :  { %646 = vmatprep.subr.msk.bf16.mxu0 %vm761_vm1, %v644_v35 }
  0x3d   :  { %649 = vmatpush3.bf16.xpose.msk.msra.mxu0 %vm761_vm1, %v644_v35 }
  0x44   :  { %572 = vmatmul.mubr.msk.f32.vlgmr.msra.gmra.mrb[0].mxu0 %vm71_vm0, %v44_v36  ;;  %v432_v36 = vshrl.u32 %v431_v32, 7 }
  0x45   :  { %574 = vmatprep.mubr.msk.f32.mxu0 %vm71_vm0, %v45_v37 }
  0x46   :  { %vm443_vm5 = vcmp.eq.s32.totalorder %v432_v36, 2  ;;  %vm436_vm6 = vcmp.eq.s32.totalorder %v432_v36, 1  ;;  %vm433_vm8 = vcmp.eq.s32.totalorder %v432_v36, 0 }
  0x48   :  { %575 = vmatmul.mubr.msk.f32.gmra.mrb[2].mxu0 %vm71_vm0, %v46_v38 }
  0x83   :  { %v64_v41 = vpop.permute.xlu1 %63 }
  0x84   :  { %v54_v40 = vpop.permute.xlu0 %53 }
  0x87   :  { %v69_v48 = vpop.permute.xlu1 %68 }
  0x88   :  { %v59_v42 = vpop.permute.xlu0 %58 }
  0x8b   :  { %v237_v63 = vpop.permute.xlu1 %236 }
  0x8c   :  { %v232_v0 = vpop.permute.xlu0 %231 }
  0x8f   :  { %v247_v6 = vpop.permute.xlu1 %246 }
  0x90   :  { %v242_v9 = vpop.permute.xlu0 %241 }
  0x94   :  { %v356_v18 = vpop.permute.xlu0 %355 }
 0x117   :  { %v573_v43 = vpop.f32.mrb[0].mxu0 }
 0x118   :  { %v204_v44 = vadd.f32 %v573_v43, %v59_v42  ;;  %v198_v45 = vpop.f32.mrb[1].mxu0 }
 0x119   :  { %v199_v46 = vadd.f32 %v198_v45, %v54_v40 }
 0x11a   :  { %v218_v47 = vmax.f32 %v204_v44, 0.0 }
 0x11b   :  { %v217_v49 = vmax.f32 %v199_v46, 0.0  ;;  %v576_v50 = vpop.f32.mrb[2].mxu0 }
 0x11c   :  { %v214_v51 = vadd.f32 %v576_v50, %v69_v48  ;;  %v208_v52 = vpop.f32.mrb[3].mxu0 }
 0x11d   :  { %v209_v53 = vadd.f32 %v208_v52, %v64_v41  ;;  %v650_v54 = vpack.c.bf16 %v218_v47, %v217_v49 }
 0x11e   :  { %v220_v55 = vmax.f32 %v214_v51, 0.0 }
 0x11f   :  { %v219_v56 = vmax.f32 %v209_v53, 0.0  ;;  %651 = vmatprep.subr.bf16.mxu1 %v650_v54 }
 0x120   :  { %653 = vmatpush3.bf16.msra.mxu1 %v650_v54 }
 0x121   :  { %v654_v57 = vpack.c.bf16 %v220_v55, %v219_v56 }
 0x123   :  { %655 = vmatprep.subr.bf16.mxu1 %v654_v57 }
 0x124   :  { %657 = vmatpush3.bf16.msra.mxu1 %v654_v57 }
 0x125   :  { %658 = vmatprep.subr.bf16.mxu1 %v706_v61 }
 0x127   :  { %586 = vmatmul.mubr.msk.f32.vlgmr.msra.gmra.mrb[0].mxu1 %vm249_vm2, %v222_v58 }
 0x128   :  { %588 = vmatprep.mubr.msk.f32.mxu1 %vm249_vm2, %v223_v59 }
 0x12b   :  { %589 = vmatmul.mubr.msk.f32.gmra.mrb[2].mxu1 %vm249_vm2, %v224_v60 }
 0x12c   :  { %599 = vmatprep.mubr.msk.f32.mxu1 %vm707_vm3, %v708_v62 }
 0x1fa   :  { %v587_v1 = vpop.f32.mrb[0].mxu1 }
 0x1fb   :  { %v334_v2 = vadd.f32 %v587_v1, %v237_v63  ;;  %v328_v3 = vpop.f32.mrb[1].mxu1 }
 0x1fc   :  { %v329_v4 = vadd.f32 %v328_v3, %v232_v0 }
 0x1fd   :  { %v348_v5 = vmax.f32 %v334_v2, 0.0 }
 0x1fe   :  { %v347_v7 = vmax.f32 %v329_v4, 0.0  ;;  %v590_v8 = vpop.f32.mrb[2].mxu1 }
 0x1ff   :  { %v344_v10 = vadd.f32 %v590_v8, %v247_v6  ;;  %v338_v11 = vpop.f32.mrb[3].mxu1 }
 0x200   :  { %v659_v12 = vpack.c.bf16 %v348_v5, %v347_v7  ;;  %v339_v13 = vadd.f32 %v338_v11, %v242_v9 }
 0x201   :  { %v350_v14 = vmax.f32 %v344_v10, 0.0 }
 0x202   :  { %v349_v15 = vmax.f32 %v339_v13, 0.0  ;;  %660 = vmatpush3.bf16.msra.mxu1 %v659_v12 }
 0x203   :  { %661 = vmatprep.subr.bf16.mxu1 %v706_v61 }
 0x204   :  { %v662_v16 = vpack.c.bf16 %v350_v14, %v349_v15 }
 0x206   :  { %663 = vmatpush3.bf16.msra.mxu1 %v662_v16 }
 0x209   :  { %600 = vmatmul.mubr.msk.f32.vlgmr.msra.gmra.mrb[4].mxu1 %vm249_vm2, %v351_v17 }
 0x2dc   :  { %v427_v19 = vpop.f32.mrb[4].mxu1 }
 0x2dd   :  { %v428_v20 = vadd.f32 %v427_v19, %v356_v18  ;;  %v601_v21 = vpop.f32.mrb[5].mxu1 }
 0x2df   :  { %v447_v22 = vand.u32 2147483647, %v428_v20  ;;  %v505_v25 = vmul.f32 -1.442695, %v428_v20  ;;  %v434_v31 = vmul.f32 1.442695, %v428_v20  ;;  %vm445_vm7 = vcmp.ne.f32.partialorder %v428_v20, %v428_v20 }
 0x2e0   :  { %v444_v39 = vmax.f32 %v428_v20, 0.0 }
 0x2e1   :  { %v448_v23 = vsub.f32 0.0, %v447_v22 }
 0x2e3   :  { %v449_v24 = vmul.f32 1.442695, %v448_v23 }
 0x2e5   :  { %671 = vpow2.f32 %v449_v24 }
 0x2e6   :  { %673 = vpow2.f32 %v505_v25 }
 0x2ef   :  { %v672_v26 = vpop.eup %671 }
 0x2f0   :  { %v451_v27 = vadd.f32 1.0, %v672_v26  ;;  %v674_v28 = vpop.eup %673  ;;  %v454_v30 = vmul.f32 -0.5, %v672_v26  ;;  %v457_v34 = vand.u32 2147483647, %v672_v26 }
 0x2f1   :  { %v440_v29 = vadd.f32 1.0, %v674_v28 }
 0x2f2   :  { %675 = vlog2.f32 %v451_v27  ;;  %v455_v33 = vadd.f32 1.0, %v454_v30  ;;  %vm458_vm4 = vcmp.lt.f32.partialorder %v457_v34, 0.0004427343 }
 0x2f3   :  { %677 = vrcp.f32 %v440_v29 }
 0x2f4   :  { %679 = vpow2.f32 %v434_v31  ;;  %v456_v38 = vmul.f32 %v672_v26, %v455_v33 }
 0x2fc   :  { %v676_v35 = vpop.eup %675 }
 0x2fd   :  { %v453_v37 = vmul.f32 0.6931472, %v676_v35  ;;  %v678_v43 = vpop.eup %677 }
 0x2fe   :  { %v680_v45 = vpop.eup %679 }
 0x2ff   :  { %v459_v40 = vsel %vm458_vm4, %v456_v38, %v453_v37 }
 0x300   :  { %v460_v41 = vadd.f32 %v459_v40, %v444_v39 }
 0x302   :  { %v461_v42 = vsel %vm445_vm7, %v428_v20, %v460_v41 }
 0x303   :  { %v462_v44 = vsel %vm443_vm5, %v461_v42, %v428_v20 }
 0x304   :  { %v463_v46 = vsel %vm436_vm6, %v678_v43, %v462_v44 }
 0x305   :  { %v464_v47 = vsel %vm433_vm8, %v680_v45, %v463_v46 }
 0x306   :  { %465 = vst [vmem:[#allocation2] sm:$0xf] %v464_v47 }
 0x307   :  { %692 = shalt.err (!%p689_p4)
}
 0x308   :  { %s693_s18 = scalar_lea.hbm %s918_s7, 64 }
 0x309   :  { %p694_p5 = scmp.ne.s32.totalorder %s918_s7, %s693_s18  ;;  %p697_p6 = scmp.lt.u32.totalorder %s693_s18, %s918_s7 }
 0x30b   :  { %p699_p7 = pnand %p697_p6, %p694_p5 }
 0x30d   :  { %702 = shalt.err (!%p699_p7)
}
 0x30e   :  { %475 = dma.vmem_to_hbm [thread:$0]  %s473_s16, 64, %s918_s7, [#allocation3]  }
 0x30f   :  { %703 = dma.done.wait [#allocation3], 64  }
 0x310   :  { %704 = vsyncadd [#allocation3], 4294967232 }
 0x311   :  { %479 = vsyncpa [#allocation3], 1 }

</bundles_post_ra>
